<compile_context>
chip_gen: v6e
topology: v6e:2x2x1
jax: 0.10.0
libtpu: 0.0.40
codegen_flags: <defaults>
</compile_context>

<pallas_src>
import functools

import jax
import jax.numpy as jnp
from jax import lax
from jax.experimental import pallas as pl
from jax.experimental.pallas import tpu as pltpu


def _contrastive_loss_kernel(x1_ref, x2_ref, lbl_ref, out_ref, *,
                             margin, true_b, block_rows):
    """One grid step: per-pair loss for `block_rows` pairs -> (8, 128) partial sum."""
    i = pl.program_id(0)
    eps = 1e-6  # torch F.pairwise_distance default: d = ||x1 - x2 + eps||_2

    x1 = x1_ref[...].astype(jnp.float32)
    x2 = x2_ref[...].astype(jnp.float32)
    diff = x1 - x2 + eps
    dist_sq = jnp.sum(diff * diff, axis=-1, keepdims=True)        # (tm, 1)
    dist = jnp.sqrt(dist_sq)                                      # (tm, 1)

    lbl = lbl_ref[...].astype(jnp.float32)                        # (tm, 1)
    hinge = jnp.maximum(margin - dist, 0.0)
    # (1 - label) * d^2 + label * clamp(margin - d, 0)^2 ; d^2 = (sqrt(d2))^2 on purpose.
    loss = (1.0 - lbl) * (dist * dist) + lbl * (hinge * hinge)    # (tm, 1)

    # Mask zero-padded / out-of-batch rows in the last tile (static true_b).
    row = lax.broadcasted_iota(jnp.int32, (block_rows, 1), 0)
    valid = (i * block_rows + row) < true_b
    loss = jnp.where(valid, loss, 0.0)

    tile_sum = jnp.sum(loss, axis=0, keepdims=True)               # (1, 1)

    # Lane-dense (8, 128) partial-sum block: tile_sum at [0, 0], zeros elsewhere.
    r8 = lax.broadcasted_iota(jnp.int32, (8, 128), 0)
    l128 = lax.broadcasted_iota(jnp.int32, (8, 128), 1)
    out_ref[...] = jnp.where((r8 == 0) & (l128 == 0), tile_sum, 0.0)


def _round_up(x, m):
    return ((x + m - 1) // m) * m


def _pad_rows(x, total_rows):
    pad = total_rows - x.shape[0]
    if pad:
        x = jnp.pad(x, ((0, pad), (0, 0)))
    return x


def _vmem_capacity_bytes():
    try:
        cap = getattr(pltpu.get_tpu_info(), "vmem_capacity_bytes", None)
        if cap:
            return int(cap)
    except Exception:
        pass
    return 64 << 20  # conservative fallback (v7x per-TensorCore VMEM)


def contrastive_loss(output1, output2, label, margin=2.0):
    """output1, output2: (B, D) float32/bfloat16; label: (B,) or (B, 1). Returns scalar f32."""
    B, D = output1.shape
    assert output2.shape == (B, D)
    label = jnp.asarray(label).reshape(B, 1)

    ROW_ALIGN = 16                                   # covers bf16 (16,128) sublane tiling
    feat_isz = jnp.dtype(output1.dtype).itemsize
    d_lanes = _round_up(D, 128)                      # feature lanes as padded in VMEM

    # --- per-generation VMEM budget (review: retune per chip) --------------
    vmem_cap = _vmem_capacity_bytes()                # 128 MiB v5e/v6e, 64 MiB v7x
    vmem_limit = max(32 << 20, min(vmem_cap - (16 << 20), 96 << 20))

    # Per-row VMEM bytes across the double-buffered streams:
    #   x1 + x2 feature tiles (2 buffers each) + bf16 label tile (lane-padded to 128).
    per_row = 2 * (2 * d_lanes * feat_isz) + 2 * (128 * 2)
    headroom = 4 << 20                               # output blocks + Mosaic internal scratch
    tm_cap = max(ROW_ALIGN, ((vmem_limit - headroom) // per_row) // ROW_ALIGN * ROW_ALIGN)
    # TODO(synk): the feature dim is not tiled; a second grid axis would be needed for a
    # D so large that even ROW_ALIGN rows exceed the VMEM budget.

    # --- grid: as few / as large tiles as VMEM allows; >=2 for v7x megacore --
    n_tiles = pl.cdiv(B, tm_cap)
    if n_tiles == 1 and B > 2 * ROW_ALIGN:
        n_tiles = 2                                  # give both v7x TensorCores work
    tm = _round_up(pl.cdiv(B, n_tiles), ROW_ALIGN)
    n_tiles = pl.cdiv(B, tm)
    B_pad = n_tiles * tm

    # Zero-pad only when B doesn't fill the last tile; padded rows are masked
    # in-kernel against the true B, so they never pollute the mean.
    x1 = _pad_rows(output1, B_pad)
    x2 = _pad_rows(output2, B_pad)
    lbl = _pad_rows(label.astype(jnp.bfloat16), B_pad)   # bf16 is exact for 0/1 labels

    kernel = functools.partial(
        _contrastive_loss_kernel, margin=float(margin), true_b=B, block_rows=tm)

    partials = pl.pallas_call(
        kernel,
        out_shape=jax.ShapeDtypeStruct((8 * n_tiles, 128), jnp.float32),
        grid=(n_tiles,),
        in_specs=[
            pl.BlockSpec((tm, D), lambda i: (i, 0)),
            pl.BlockSpec((tm, D), lambda i: (i, 0)),
            pl.BlockSpec((tm, 1), lambda i: (i, 0)),
        ],
        out_specs=pl.BlockSpec((8, 128), lambda i: (i, 0)),
        compiler_params=pltpu.CompilerParams(
            dimension_semantics=("parallel",),
            vmem_limit_bytes=int(vmem_limit),
        ),
    )(x1, x2, lbl)

    # Exact mean over the true batch (only [tile, 0, 0] entries are nonzero).
    return jnp.sum(partials) / B


def _reference(output1, output2, label, margin=2.0):
    eps = 1e-6
    diff = output1.astype(jnp.float32) - output2.astype(jnp.float32) + eps
    d = jnp.sqrt(jnp.sum(diff * diff, axis=-1, keepdims=True))
    lbl = label.reshape(-1, 1).astype(jnp.float32)
    return jnp.mean((1.0 - lbl) * d * d
                    + lbl * jnp.square(jnp.maximum(margin - d, 0.0)))


if __name__ == "__main__":
    key = jax.random.PRNGKey(0)

    # (B, D): small single-tile cases, a non-aligned batch, a wider feature dim,
    # a multi-tile case exercising the last-tile row mask, and a bf16 input case.
    cases = [
        ((8, 32), jnp.float32),
        ((13, 32), jnp.float32),
        ((8, 256), jnp.float32),
        ((300, 64), jnp.float32),
        ((64, 32), jnp.bfloat16),
    ]

    for (B, D), dt in cases:
        key, k1, k2, k3 = jax.random.split(key, 4)
        output1 = jax.random.normal(k1, (B, D), dtype=jnp.float32).astype(dt)
        output2 = jax.random.normal(k2, (B, D), dtype=jnp.float32).astype(dt)
        label = jax.random.bernoulli(k3, p=0.5, shape=(B, 1)).astype(jnp.float32)

        loss = contrastive_loss(output1, output2, label, margin=2.0)
        jax.block_until_ready(loss)

        ref = _reference(output1, output2, label, margin=2.0)
        assert jnp.allclose(loss, ref, rtol=3e-5, atol=1e-5), ((B, D), dt, loss, ref)

    print("KERNEL_OK")
</pallas_src>

<mosaic_0001>
module attributes {stable_mosaic.version = 11 : i64} {
  func.func @_contrastive_loss_kernel(%arg0: i32, %arg1: memref<16x32xf32, #tpu.memory_space<vmem>>, %arg2: memref<16x32xf32, #tpu.memory_space<vmem>>, %arg3: memref<16x1xbf16, #tpu.memory_space<vmem>>, %arg4: memref<8x128xf32, #tpu.memory_space<vmem>>) attributes {dimension_semantics = [#tpu.dimension_semantics<parallel>], iteration_bounds = array<i64: 1>, scalar_prefetch = 0 : i64, scratch_operands = 0 : i64, tpu.core_type = #tpu.core_type<tc>, window_params = [{transform_indices = @transform_0, window_bounds = array<i64: 16, 32>}, {transform_indices = @transform_1, window_bounds = array<i64: 16, 32>}, {transform_indices = @transform_2, window_bounds = array<i64: 16, 1>}, {transform_indices = @transform_3, window_bounds = array<i64: 8, 128>}]} {
    %c0 = arith.constant 0 : index
    %c0_0 = arith.constant 0 : index
    %0 = vector.load %arg1[%c0, %c0_0] : memref<16x32xf32, #tpu.memory_space<vmem>>, vector<16x32xf32>
    %c0_1 = arith.constant 0 : index
    %c0_2 = arith.constant 0 : index
    %1 = vector.load %arg2[%c0_1, %c0_2] : memref<16x32xf32, #tpu.memory_space<vmem>>, vector<16x32xf32>
    %2 = arith.subf %0, %1 : vector<16x32xf32>
    %cst = arith.constant 9.99999997E-7 : f32
    %3 = vector.broadcast %cst : f32 to vector<16x32xf32>
    %4 = arith.addf %2, %3 : vector<16x32xf32>
    %5 = arith.mulf %4, %4 : vector<16x32xf32>
    %cst_3 = arith.constant dense<0.000000e+00> : vector<16xf32>
    %6 = vector.multi_reduction <add>, %5, %cst_3 [1] : vector<16x32xf32> to vector<16xf32>
    %7 = vector.shape_cast %6 : vector<16xf32> to vector<16x1xf32>
    %8 = math.sqrt %7 : vector<16x1xf32>
    %c0_4 = arith.constant 0 : index
    %c0_5 = arith.constant 0 : index
    %9 = vector.load %arg3[%c0_4, %c0_5] : memref<16x1xbf16, #tpu.memory_space<vmem>>, vector<16x1xbf16>
    %10 = arith.extf %9 : vector<16x1xbf16> to vector<16x1xf32>
    %cst_6 = arith.constant 2.000000e+00 : f32
    %11 = vector.broadcast %cst_6 : f32 to vector<16x1xf32>
    %12 = arith.subf %11, %8 : vector<16x1xf32>
    %cst_7 = arith.constant 0.000000e+00 : f32
    %13 = vector.broadcast %cst_7 : f32 to vector<16x1xf32>
    %14 = arith.maximumf %12, %13 : vector<16x1xf32>
    %cst_8 = arith.constant 1.000000e+00 : f32
    %15 = vector.broadcast %cst_8 : f32 to vector<16x1xf32>
    %16 = arith.subf %15, %10 : vector<16x1xf32>
    %17 = arith.mulf %8, %8 : vector<16x1xf32>
    %18 = arith.mulf %16, %17 : vector<16x1xf32>
    %19 = arith.mulf %14, %14 : vector<16x1xf32>
    %20 = arith.mulf %10, %19 : vector<16x1xf32>
    %21 = arith.addf %18, %20 : vector<16x1xf32>
    %22 = tpu.iota {dimensions = array<i32: 0>} : vector<16x1xi32>
    %c16_i32 = arith.constant 16 : i32
    %23 = arith.muli %arg0, %c16_i32 : i32
    %24 = vector.broadcast %23 : i32 to vector<16x1xi32>
    %25 = arith.addi %24, %22 : vector<16x1xi32>
    %c8_i32 = arith.constant 8 : i32
    %26 = vector.broadcast %c8_i32 : i32 to vector<16x1xi32>
    %27 = arith.cmpi slt, %25, %26 : vector<16x1xi32>
    %cst_9 = arith.constant 0.000000e+00 : f32
    %28 = vector.broadcast %cst_9 : f32 to vector<16x1xf32>
    %29 = arith.select %27, %21, %28 : vector<16x1xi1>, vector<16x1xf32>
    %cst_10 = arith.constant dense<0.000000e+00> : vector<1xf32>
    %30 = vector.multi_reduction <add>, %29, %cst_10 [0] : vector<16x1xf32> to vector<1xf32>
    %31 = vector.shape_cast %30 : vector<1xf32> to vector<1x1xf32>
    %32 = tpu.iota {dimensions = array<i32: 0>} : vector<8x128xi32>
    %33 = tpu.iota {dimensions = array<i32: 1>} : vector<8x128xi32>
    %c0_i32 = arith.constant 0 : i32
    %34 = vector.broadcast %c0_i32 : i32 to vector<8x128xi32>
    %35 = arith.cmpi eq, %32, %34 : vector<8x128xi32>
    %c0_i32_11 = arith.constant 0 : i32
    %36 = vector.broadcast %c0_i32_11 : i32 to vector<8x128xi32>
    %37 = arith.cmpi eq, %33, %36 : vector<8x128xi32>
    %38 = arith.andi %35, %37 : vector<8x128xi1>
    %cst_12 = arith.constant 0.000000e+00 : f32
    %39 = vector.shape_cast %31 : vector<1x1xf32> to vector<1x1xf32>
    %40 = vector.broadcast %39 : vector<1x1xf32> to vector<8x128xf32>
    %41 = vector.broadcast %cst_12 : f32 to vector<8x128xf32>
    %42 = arith.select %38, %40, %41 : vector<8x128xi1>, vector<8x128xf32>
    %c0_13 = arith.constant 0 : index
    %c0_14 = arith.constant 0 : index
    %43 = vector.load %arg4[%c0_13, %c0_14] : memref<8x128xf32, #tpu.memory_space<vmem>>, vector<8x128xf32>
    tpu.vector_store %arg4[%c0_13, %c0_14], %42 {strides = array<i32>} : memref<8x128xf32, #tpu.memory_space<vmem>>, vector<8x128xf32>,
    return
  }
  func.func @transform_0(%arg0: i32) -> (i32, i32) {
    %c0_i32 = arith.constant 0 : i32
    %c0_i32_0 = arith.constant 0 : i32
    return %arg0, %c0_i32 : i32, i32
  }
  func.func @transform_1(%arg0: i32) -> (i32, i32) {
    %c0_i32 = arith.constant 0 : i32
    %c0_i32_0 = arith.constant 0 : i32
    return %arg0, %c0_i32 : i32, i32
  }
  func.func @transform_2(%arg0: i32) -> (i32, i32) {
    %c0_i32 = arith.constant 0 : i32
    %c0_i32_0 = arith.constant 0 : i32
    return %arg0, %c0_i32 : i32, i32
  }
  func.func @transform_3(%arg0: i32) -> (i32, i32) {
    %c0_i32 = arith.constant 0 : i32
    %c0_i32_0 = arith.constant 0 : i32
    return %arg0, %c0_i32 : i32, i32
  }
}

</mosaic_0001>

<bundles_post_ra>
// kernel: tpu_custom_call.1
= control target key start
LH: loop header
LB: loop body
LE: loop exit
PB: predicated region body
PF: predicated region fallthrough
CT: control target
= control target key end

     0   :  { %8 = vsyncpa [#allocation3], 0  ;;  %s256_s0 = inlined_call_operand.hbm [shape: f32[16,32], index: 0, kind: input, shape index: {}]   ;;  %s257_s1 = inlined_call_operand.hbm [shape: f32[16,32], index: 1, kind: input, shape index: {}]   ;;  %s258_s2 = inlined_call_operand.vmem [shape: bf16[16,1], index: 2, kind: input, shape index: {}]   ;;  %s259_s3 = inlined_call_operand.hbm [shape: f32[8,128], index: 3, kind: output, shape index: {}]  }
   0x1   :  { %9 = vsyncpa [#allocation6], 0 }
   0x2   :  { %10 = vsyncpa [#allocation4], 0  ;;  %s218_s12 = smov [#allocation2]  }
   0x3   :  { %s16_s13 = sshll.u32 %s218_s12, 4  ;;  %s17_s13 = int_to_ptr.vmem [resolvable:$true] %s16_s13 }
   0x4   :  { %s160_s14 = scalar_lea.vmem %s17_s13, 256  ;;  %p165_p1 = scmp.lt.s32.totalorder %s17_s13, %s17_s13 }
   0x5   :  { %p161_p0 = scmp.ne.s32.totalorder %s17_s13, %s160_s14  ;;  %p166_p2 = scmp.lt.s32.totalorder %s160_s14, %s160_s14 }
   0x7   :  { %p167_p3 = por %p166_p2, %p165_p1 }
   0x9   :  { %p168_p4 = pnand %p167_p3, %p161_p0 }
   0xb   :  { %171 = shalt.err (!%p168_p4)
}
   0xc   :  { %s219_s15 = smov 128   ;;  %s220_s16 = smov 8  }
   0xd   :  { %22 = dma.hbm_to_vmem [thread:$0]  %s256_s0, 256, %s17_s13, [#allocation3], %s219_s15, %s219_s15, %s220_s16  }
   0xe   :  { %s221_s19 = smov [#allocation5]  }
   0xf   :  { %s28_s20 = sshll.u32 %s221_s19, 4  ;;  %s29_s20 = int_to_ptr.vmem [resolvable:$true] %s28_s20 }
  0x10   :  { %s180_s21 = scalar_lea.vmem %s29_s20, 256  ;;  %p185_p6 = scmp.lt.s32.totalorder %s29_s20, %s29_s20 }
  0x11   :  { %p181_p5 = scmp.ne.s32.totalorder %s29_s20, %s180_s21  ;;  %p186_p7 = scmp.lt.s32.totalorder %s180_s21, %s180_s21 }
  0x13   :  { %p187_p8 = por %p186_p7, %p185_p6 }
  0x15   :  { %p188_p9 = pnand %p187_p8, %p181_p5 }
  0x17   :  { %191 = shalt.err (!%p188_p9)
}
  0x18   :  { %34 = dma.hbm_to_vmem [thread:$0]  %s257_s1, 256, %s29_s20, [#allocation6], %s219_s15, %s219_s15, %s220_s16  }
  0x19   :  { %212 = dma.done.wait [#allocation3], 256  }
  0x1a   :  { %213 = vsyncadd [#allocation3], 4294967040 }
  0x1b   :  { %214 = dma.done.wait [#allocation6], 256  }
  0x1c   :  { %215 = vsyncadd [#allocation6], 4294967040  ;;  %v43_v0 = vld [vmem:[#allocation2] sm:$0xff]  ;;  %v45_v1 = vld [vmem:[#allocation5] sm:$0xff]  ;;  %vm53_vm0 = vcmask 261120   ;;  %v222_v6 = vmov 0   ;;  %v94_v30 = vlaneseq }
  0x1d   :  { %v47_v2 = vsub.f32 %v43_v0, %v45_v1  ;;  %149 = vset.pattern.permute.xlu0 %v222_v6  ;;  %v74_v9 = vld [vmem:[%s258_s2] sm:$0xf]  ;;  %vm105_vm3 = vcmask 7168   ;;  %s223_s1 = smov [#allocation7]  }
  0x1e   :  { %v76_v13 = vunpack.c.l.bf16 %v74_v9  ;;  %v95_v31 = vshrl.u32 %v94_v30, 7  ;;  %v116_v32 = vand.u32 127, %v94_v30  ;;  %s133_s2 = sshll.u32 %s223_s1, 4  ;;  %s134_s2 = int_to_ptr.vmem [resolvable:$true] %s133_s2 }
  0x1f   :  { %v49_v3 = vadd.f32 1e-06, %v47_v2  ;;  %s192_s25 = scalar_lea.vmem %s134_s2, 128  ;;  %p197_p11 = scmp.lt.s32.totalorder %s134_s2, %s134_s2 }
  0x20   :  { %v82_v17 = vsub.f32 1.0, %v76_v13  ;;  %vm117_vm4 = vcmp.eq.s32.totalorder %v95_v31, 0  ;;  %vm118_vm5 = vcmp.eq.s32.totalorder %v116_v32, 0  ;;  %p193_p10 = scmp.ne.s32.totalorder %s134_s2, %s192_s25  ;;  %p198_p12 = scmp.lt.s32.totalorder %s192_s25, %s192_s25 }
  0x21   :  { %v51_v4 = vmul.f32 %v49_v3, %v49_v3  ;;  %vm119_vm6 = vmand %vm117_vm4, %vm118_vm5 }
  0x22   :  { %p199_p13 = por %p198_p12, %p197_p11 }
  0x23   :  { %v54_v5 = vsel %vm53_vm0, %v51_v4, 0.0 }
  0x24   :  { %55 = vadd.xlane.f32.xlu0 %v54_v5  ;;  %p200_p0 = pnand %p199_p13, %p193_p10 }
  0xad   :  { %v56_v7 = vpop.xlane.xlu0 %55 }
  0xae   :  { %150 = vrsqrt.f32 %v56_v7  ;;  %vm62_vm1 = vcmp.eq.f32.partialorder %v56_v7, inf  ;;  %v65_v11 = vand.u32 2147483648, %v56_v7  ;;  %vm64_vm2 = vcmp.eq.f32.partialorder %v56_v7, 0.0 }
  0xbb   :  { %v151_v8 = vpop.eup %150 }
  0xbc   :  { %v61_v10 = vmul.f32 %v151_v8, %v56_v7 }
  0xbe   :  { %v63_v12 = vsel %vm62_vm1, %v56_v7, %v61_v10 }
  0xbf   :  { %v66_v14 = vsel %vm64_vm2, %v65_v11, %v63_v12 }
  0xc0   :  { %v78_v15 = vsub.f32 2.0, %v66_v14  ;;  %v84_v18 = vmul.f32 %v66_v14, %v66_v14 }
  0xc2   :  { %v80_v16 = vmax.f32 %v78_v15, 0.0  ;;  %v86_v20 = vmul.f32 %v84_v18, %v82_v17 }
  0xc4   :  { %v88_v19 = vmul.f32 %v80_v16, %v80_v16 }
  0xc6   :  { %v90_v21 = vmul.f32 %v88_v19, %v76_v13 }
  0xc8   :  { %v92_v22 = vadd.f32 %v90_v21, %v86_v20 }
  0xca   :  { %v106_v23 = vsel %vm105_vm3, %v92_v22, 0.0 }
  0xcb   :  { %v109_v24 = vrot.slane %v106_v23, 4 }
  0xcd   :  { %v110_v25 = vadd.f32 %v109_v24, %v106_v23 }
  0xcf   :  { %v111_v26 = vrot.slane %v110_v25, 2 }
  0xd1   :  { %v112_v27 = vadd.f32 %v111_v26, %v110_v25 }
  0xd3   :  { %v113_v28 = vrot.slane %v112_v27, 1 }
  0xd5   :  { %v114_v29 = vadd.f32 %v113_v28, %v112_v27 }
  0xd7   :  { %122 = vperm.xlu0 %149, %v114_v29  }
 0x152   :  { %v123_v33 = vpop.permute.xlu0 %122 }
 0x153   :  { %v125_v34 = vsel %vm119_vm6, %v123_v33, 0.0 }
 0x154   :  { %126 = vst [vmem:[#allocation7] sm:$0xff] %v125_v34 }
 0x155   :  { %203 = shalt.err (!%p200_p0)
}
 0x156   :  { %136 = dma.vmem_to_hbm [thread:$0]  %s134_s2, 128, %s259_s3, [#allocation4]  }
 0x157   :  { %216 = dma.done.wait [#allocation4], 128  }
 0x158   :  { %217 = vsyncadd [#allocation4], 4294967168 }
 0x159   :  { %140 = vsyncpa [#allocation3], 1 }
 0x15a   :  { %141 = vsyncpa [#allocation6], 1 }
 0x15b   :  { %142 = vsyncpa [#allocation4], 1 }

</bundles_post_ra>
